<compile_context>
chip_gen: v6e
topology: v6e:2x2x1
jax: 0.10.0
libtpu: 0.0.40
codegen_flags: <defaults>
</compile_context>

<pallas_src>
import jax
import jax.numpy as jnp
from jax.experimental import pallas as pl
from jax.experimental.pallas import tpu as pltpu


def _pos_enc_kernel(x_ref, pos_ref, o_ref):
    # x_ref:   (TB, TS, D) tile of the input
    # pos_ref: (1,  TS, D) positional-embedding tile (broadcast over TB)
    # o_ref:   (TB, TS, D) output tile
    o_ref[...] = (x_ref[...] + pos_ref[...]).astype(o_ref.dtype)


def _chip_config():
    """Per-generation tiling budgets (best-effort detection, safe fallback)."""
    kind = ""
    try:
        kind = jax.devices()[0].device_kind.lower()
    except Exception:
        pass
    if "v7" in kind:
        # 3.2 TB/s HBM, 64 MiB VMEM, 2 TensorCores: bigger tiles, >=4 steps.
        return dict(budget=8 << 20, vmem_limit=48 << 20, min_steps=4)
    if "v6" in kind:
        # 1.4 TB/s, 128 MiB VMEM: 8 MiB tiles shave per-step overhead for free.
        return dict(budget=8 << 20, vmem_limit=40 << 20, min_steps=2)
    # v5e / unknown: 0.82 TB/s; 4 MiB tiles already amortize overhead to <4%.
    return dict(budget=4 << 20, vmem_limit=32 << 20, min_steps=2)


def _round_up(v, m):
    return ((v + m - 1) // m) * m


def _choose_blocks(B, S, D, itemsize, budget, min_steps):
    """Pick (tb, ts): batch rows and sequence rows per grid step."""
    row_bytes = max(1, S * D * itemsize)

    if row_bytes > budget:
        # A single (S, D) row exceeds the buffer budget (long-sequence ViTs):
        # tile the sequence axis so double-buffered x/out still fit VMEM.
        tb = 1
        ts = max(8, (budget // max(1, D * itemsize)) // 8 * 8)
        ts = min(ts, S)
        return tb, int(ts)

    # Batch tiling: ~budget bytes per buffer, then balance the grid so steps
    # are near-equal (e.g. B=8, tb=6 -> 4+4 instead of 6+2).
    tb = min(B, max(1, budget // row_bytes))
    n_b = pl.cdiv(B, tb)
    if n_b < min_steps:
        n_b = min(B, min_steps)
    tb = pl.cdiv(B, n_b)
    n_b = pl.cdiv(B, tb)
    tb = pl.cdiv(B, n_b)

    ts = S
    if n_b < min_steps and S >= 16:
        # Small batch (e.g. B=1 inference on v7x): add sequence tiling so both
        # TensorCores get work and the pipeline has >=2 steps per core.
        want_seq_steps = pl.cdiv(min_steps, n_b)
        ts = _round_up(max(8, pl.cdiv(S, want_seq_steps)), 8)
        ts_cap = max(8, (budget // max(1, tb * D * itemsize)) // 8 * 8)
        ts = min(ts, ts_cap, S)
        if ts < S:
            ts = max(8, (ts // 8) * 8)  # keep the (8, x) sublane constraint
        else:
            ts = S
    return int(tb), int(ts)


def positional_encoding(x, pos_embedding, *, batch_block=None, seq_block=None,
                        strict_promotion=False):
    """x: [B, S, D], pos_embedding: [1, S, D] -> [B, S, D]"""
    B, S, D = x.shape
    assert pos_embedding.shape == (1, S, D)

    cfg = _chip_config()

    if strict_promotion:
        # torch-style promotion (bf16 x + f32 pos -> f32 out).
        out_dtype = jnp.result_type(x.dtype, pos_embedding.dtype)
    else:
        # Keep the activation dtype: avoids doubling HBM writeback when x is
        # bf16 and pos is f32.  The one-time pos cast below is negligible.
        out_dtype = x.dtype
        if pos_embedding.dtype != out_dtype:
            pos_embedding = pos_embedding.astype(out_dtype)

    itemsize = jnp.dtype(out_dtype).itemsize
    tb, ts = _choose_blocks(B, S, D, itemsize, cfg["budget"], cfg["min_steps"])
    if batch_block is not None:
        tb = int(batch_block)
    if seq_block is not None:
        ts = int(seq_block)

    n_b = pl.cdiv(B, tb)
    n_s = pl.cdiv(S, ts)
    grid = (n_b, n_s)

    # Advisory: this call is pure HBM bandwidth (read x + pos, write out).
    cost = pl.CostEstimate(
        flops=B * S * D,
        transcendentals=0,
        bytes_accessed=(2 * B * S * D + S * D) * itemsize,
    )

    # When the sequence axis is not tiled, the pos block index is constant
    # across the grid, so a single buffer suffices (frees dead VMEM).
    pos_kwargs = dict(pipeline_mode=pl.Buffered(1)) if n_s == 1 else {}

    def build(pos_spec_kwargs):
        return pl.pallas_call(
            _pos_enc_kernel,
            out_shape=jax.ShapeDtypeStruct((B, S, D), out_dtype),
            grid=grid,
            in_specs=[
                pl.BlockSpec((tb, ts, D), lambda b, s: (b, s, 0)),
                pl.BlockSpec((1, ts, D), lambda b, s: (0, s, 0),
                             **pos_spec_kwargs),
            ],
            out_specs=pl.BlockSpec((tb, ts, D), lambda b, s: (b, s, 0)),
            compiler_params=pltpu.CompilerParams(
                dimension_semantics=("parallel", "parallel"),
                vmem_limit_bytes=cfg["vmem_limit"],
            ),
            cost_estimate=cost,
        )

    try:
        return build(pos_kwargs)(x, pos_embedding)
    except Exception:
        if not pos_kwargs:
            raise
        # Conservative fallback: default double-buffering for pos.
        return build({})(x, pos_embedding)


if __name__ == "__main__":
    # Small shapes consistent with the module:
    # num_patches = 8 -> seq = num_patches + 1 = 9, embed_dim = 32, batch = 2
    batch = 2
    num_patches = 8
    embed_dim = 32
    seq = num_patches + 1

    key = jax.random.PRNGKey(0)
    kx, kp = jax.random.split(key)

    x = jax.random.normal(kx, (batch, seq, embed_dim), dtype=jnp.float32)
    # Deterministic init of the parameter (stand-in for torch.randn init).
    pos_embedding = jax.random.normal(kp, (1, seq, embed_dim), dtype=jnp.float32)

    out = positional_encoding(x, pos_embedding)
    out = jax.block_until_ready(out)

    # Reference check against plain JAX broadcasting add.
    ref = x + pos_embedding
    assert out.shape == (batch, seq, embed_dim)
    assert out.dtype == ref.dtype
    assert jnp.allclose(out, ref, atol=1e-6), "mismatch vs reference"

    print("KERNEL_OK")
</pallas_src>

<mosaic_0001>
module attributes {stable_mosaic.version = 11 : i64} {
  func.func @_pos_enc_kernel(%arg0: i32, %arg1: i32, %arg2: memref<1x9x32xf32, #tpu.memory_space<vmem>>, %arg3: memref<1x9x32xf32, #tpu.memory_space<vmem>>, %arg4: memref<1x9x32xf32, #tpu.memory_space<vmem>>) attributes {dimension_semantics = [#tpu.dimension_semantics<parallel>, #tpu.dimension_semantics<parallel>], iteration_bounds = array<i64: 2, 1>, scalar_prefetch = 0 : i64, scratch_operands = 0 : i64, tpu.core_type = #tpu.core_type<tc>, window_params = [{transform_indices = @transform_0, window_bounds = array<i64: 1, 9, 32>}, {pipeline_mode = #tpu.pipeline_mode<synchronous>, transform_indices = @transform_1, window_bounds = array<i64: 1, 9, 32>}, {transform_indices = @transform_2, window_bounds = array<i64: 1, 9, 32>}]} {
    %c0 = arith.constant 0 : index
    %c0_0 = arith.constant 0 : index
    %c0_1 = arith.constant 0 : index
    %0 = vector.load %arg2[%c0, %c0_0, %c0_1] : memref<1x9x32xf32, #tpu.memory_space<vmem>>, vector<1x9x32xf32>
    %c0_2 = arith.constant 0 : index
    %c0_3 = arith.constant 0 : index
    %c0_4 = arith.constant 0 : index
    %1 = vector.load %arg3[%c0_2, %c0_3, %c0_4] : memref<1x9x32xf32, #tpu.memory_space<vmem>>, vector<1x9x32xf32>
    %2 = arith.addf %0, %1 : vector<1x9x32xf32>
    %c0_5 = arith.constant 0 : index
    %c0_6 = arith.constant 0 : index
    %c0_7 = arith.constant 0 : index
    %3 = vector.load %arg4[%c0_5, %c0_6, %c0_7] : memref<1x9x32xf32, #tpu.memory_space<vmem>>, vector<1x9x32xf32>
    tpu.vector_store %arg4[%c0_5, %c0_6, %c0_7], %2 {strides = array<i32>} : memref<1x9x32xf32, #tpu.memory_space<vmem>>, vector<1x9x32xf32>,
    return
  }
  func.func @transform_0(%arg0: i32, %arg1: i32) -> (i32, i32, i32) {
    %c0_i32 = arith.constant 0 : i32
    %c0_i32_0 = arith.constant 0 : i32
    return %arg0, %arg1, %c0_i32 : i32, i32, i32
  }
  func.func @transform_1(%arg0: i32, %arg1: i32) -> (i32, i32, i32) {
    %c0_i32 = arith.constant 0 : i32
    %c0_i32_0 = arith.constant 0 : i32
    %c0_i32_1 = arith.constant 0 : i32
    return %c0_i32, %arg1, %c0_i32_0 : i32, i32, i32
  }
  func.func @transform_2(%arg0: i32, %arg1: i32) -> (i32, i32, i32) {
    %c0_i32 = arith.constant 0 : i32
    %c0_i32_0 = arith.constant 0 : i32
    return %arg0, %arg1, %c0_i32 : i32, i32, i32
  }
}

module attributes {stable_mosaic.version = 11 : i64} {
  func.func @_pos_enc_kernel(%arg0: i32, %arg1: i32, %arg2: memref<1x9x32xf32, #tpu.memory_space<vmem>>, %arg3: memref<1x9x32xf32, #tpu.memory_space<vmem>>, %arg4: memref<1x9x32xf32, #tpu.memory_space<vmem>>) attributes {dimension_semantics = [#tpu.dimension_semantics<parallel>, #tpu.dimension_semantics<parallel>], iteration_bounds = array<i64: 2, 1>, scalar_prefetch = 0 : i64, scratch_operands = 0 : i64, tpu.core_type = #tpu.core_type<tc>, window_params = [{transform_indices = @transform_0, window_bounds = array<i64: 1, 9, 32>}, {transform_indices = @transform_1, window_bounds = array<i64: 1, 9, 32>}, {transform_indices = @transform_2, window_bounds = array<i64: 1, 9, 32>}]} {
    %c0 = arith.constant 0 : index
    %c0_0 = arith.constant 0 : index
    %c0_1 = arith.constant 0 : index
    %0 = vector.load %arg2[%c0, %c0_0, %c0_1] : memref<1x9x32xf32, #tpu.memory_space<vmem>>, vector<1x9x32xf32>
    %c0_2 = arith.constant 0 : index
    %c0_3 = arith.constant 0 : index
    %c0_4 = arith.constant 0 : index
    %1 = vector.load %arg3[%c0_2, %c0_3, %c0_4] : memref<1x9x32xf32, #tpu.memory_space<vmem>>, vector<1x9x32xf32>
    %2 = arith.addf %0, %1 : vector<1x9x32xf32>
    %c0_5 = arith.constant 0 : index
    %c0_6 = arith.constant 0 : index
    %c0_7 = arith.constant 0 : index
    %3 = vector.load %arg4[%c0_5, %c0_6, %c0_7] : memref<1x9x32xf32, #tpu.memory_space<vmem>>, vector<1x9x32xf32>
    tpu.vector_store %arg4[%c0_5, %c0_6, %c0_7], %2 {strides = array<i32>} : memref<1x9x32xf32, #tpu.memory_space<vmem>>, vector<1x9x32xf32>,
    return
  }
  func.func @transform_0(%arg0: i32, %arg1: i32) -> (i32, i32, i32) {
    %c0_i32 = arith.constant 0 : i32
    %c0_i32_0 = arith.constant 0 : i32
    return %arg0, %arg1, %c0_i32 : i32, i32, i32
  }
  func.func @transform_1(%arg0: i32, %arg1: i32) -> (i32, i32, i32) {
    %c0_i32 = arith.constant 0 : i32
    %c0_i32_0 = arith.constant 0 : i32
    %c0_i32_1 = arith.constant 0 : i32
    return %c0_i32, %arg1, %c0_i32_0 : i32, i32, i32
  }
  func.func @transform_2(%arg0: i32, %arg1: i32) -> (i32, i32, i32) {
    %c0_i32 = arith.constant 0 : i32
    %c0_i32_0 = arith.constant 0 : i32
    return %arg0, %arg1, %c0_i32 : i32, i32, i32
  }
}

</mosaic_0001>

<bundles_post_ra>
// kernel: tpu_custom_call.1
= control target key start
LH: loop header
LB: loop body
LE: loop exit
PB: predicated region body
PF: predicated region fallthrough
CT: control target
= control target key end

     0   :  { %s394_s9 = smov 0   ;;  %s396_s10 = smov 0   ;;  %s421_s0 = inlined_call_operand.vmem [shape: f32[2,9,32], index: 0, kind: input, shape index: {}]   ;;  %s422_s1 = inlined_call_operand.vmem [shape: f32[1,9,32], index: 1, kind: input, shape index: {}]   ;;  %s423_s2 = inlined_call_operand.vmem [shape: f32[2,9,32], index: 2, kind: output, shape index: {}]  }
   0x1   :  { %s398_s11 = smov 0  }
   0x2 LB: > { %s24_s12 = sadd.s32 1, %s373_s10  ;;  %p322_p0 = scmp.ge.s32.totalorder %s377_s11, 1  ;;  %s377_s11 = sphi %s398_s11, %s12_s11   ;;  %s373_s10 = sphi %s396_s10, %s425_s10   ;;  %s369_s9 = sphi %s394_s9, %s424_s9  }
   0x3   : > { %p26_p1 = scmp.ge.s32.totalorder %s24_s12, 2  ;;  %p144_p2 = scmp.lt.s32.totalorder %s377_s11, 3 }
   0x5   : > { %s427_s12 = smov (%p26_p1, %s24_s12), 0  ;;  %p145_p3 = pnand %p322_p0, %p144_p2 }
   0x6   : > { %p180_p4 = scmp.lt.s32.totalorder (!%p145_p3), %s369_s9, 1 }
   0x7   : > { %148 = sbr.rel (%p145_p3) target bundleno = 20 (0x14), region = 28 }
   0xc   : > { %s429_s9 = smov (!%p180_p4, %s369_s9), 1  ;;  %v207_v0 = vld [vmem:[%s422_s1] sm:$0xff]  ;;  %v208_v1 = vld [vmem:[%s422_s1 + $0x8] sm:$0x1]  ;;  %vm211_vm0 = vcmask 261120   ;;  %vm213_vm1 = vcmask 253952  }
   0xd   : > { %s329_s13 = sshll.u32 %s429_s9, 4 }
   0xe   : > { %s187_s20 = scalar_lea.vmem %s421_s0, %s329_s13  ;;  %s203_s23 = scalar_lea.vmem %s423_s2, %s329_s13 }
   0xf   : > { %v205_v2 = vld [vmem:[%s187_s20] sm:$0xff]  ;;  %v206_v3 = vld [vmem:[%s187_s20 + $0x8] sm:$0x1] }
  0x10   : > { %v209_v4 = vadd.f32 %v207_v0, %v205_v2  ;;  %v210_v5 = vadd.f32 %v208_v1, %v206_v3 }
  0x12   : > { %212 = vst.msk [vmem:[%s203_s23] sm:$0xff] %vm211_vm0, %v209_v4 }
  0x13   : > { %214 = vst.msk [vmem:[%s203_s23 + $0x8] sm:$0x1] %vm213_vm1, %v210_v5 }
  0x14 PF: > { %s12_s11 = sadd.s32 1, %s377_s11   ;;  %s424_s9 = smov %s373_s10 }
  0x15   : > { %p9_p5 = scmp.ge.s32.totalorder %s12_s11, 4   ;;  %s425_s10 = smov %s427_s12 }
  0x17   :  { %11 = sbr.rel (!%p9_p5) target bundleno = 2 (0x2), region = 61 }

// kernel: tpu_custom_call.1
= control target key start
LH: loop header
LB: loop body
LE: loop exit
PB: predicated region body
PF: predicated region fallthrough
CT: control target
= control target key end

     0   :  { %s394_s9 = smov 0   ;;  %s396_s10 = smov 0   ;;  %s421_s0 = inlined_call_operand.vmem [shape: f32[2,9,32], index: 0, kind: input, shape index: {}]   ;;  %s422_s1 = inlined_call_operand.vmem [shape: f32[1,9,32], index: 1, kind: input, shape index: {}]   ;;  %s423_s2 = inlined_call_operand.vmem [shape: f32[2,9,32], index: 2, kind: output, shape index: {}]  }
   0x1   :  { %s398_s11 = smov 0  }
   0x2 LB: > { %s24_s12 = sadd.s32 1, %s373_s10  ;;  %p322_p0 = scmp.ge.s32.totalorder %s377_s11, 1  ;;  %s377_s11 = sphi %s398_s11, %s12_s11   ;;  %s373_s10 = sphi %s396_s10, %s425_s10   ;;  %s369_s9 = sphi %s394_s9, %s424_s9  }
   0x3   : > { %p26_p1 = scmp.ge.s32.totalorder %s24_s12, 2  ;;  %p144_p2 = scmp.lt.s32.totalorder %s377_s11, 3 }
   0x5   : > { %s427_s12 = smov (%p26_p1, %s24_s12), 0  ;;  %p145_p3 = pnand %p322_p0, %p144_p2 }
   0x6   : > { %p180_p4 = scmp.lt.s32.totalorder (!%p145_p3), %s369_s9, 1 }
   0x7   : > { %148 = sbr.rel (%p145_p3) target bundleno = 20 (0x14), region = 28 }
   0xc   : > { %s429_s9 = smov (!%p180_p4, %s369_s9), 1  ;;  %v207_v0 = vld [vmem:[%s422_s1] sm:$0xff]  ;;  %v208_v1 = vld [vmem:[%s422_s1 + $0x8] sm:$0x1]  ;;  %vm211_vm0 = vcmask 261120   ;;  %vm213_vm1 = vcmask 253952  }
   0xd   : > { %s329_s13 = sshll.u32 %s429_s9, 4 }
   0xe   : > { %s187_s20 = scalar_lea.vmem %s421_s0, %s329_s13  ;;  %s203_s23 = scalar_lea.vmem %s423_s2, %s329_s13 }
   0xf   : > { %v205_v2 = vld [vmem:[%s187_s20] sm:$0xff]  ;;  %v206_v3 = vld [vmem:[%s187_s20 + $0x8] sm:$0x1] }
  0x10   : > { %v209_v4 = vadd.f32 %v207_v0, %v205_v2  ;;  %v210_v5 = vadd.f32 %v208_v1, %v206_v3 }
  0x12   : > { %212 = vst.msk [vmem:[%s203_s23] sm:$0xff] %vm211_vm0, %v209_v4 }
  0x13   : > { %214 = vst.msk [vmem:[%s203_s23 + $0x8] sm:$0x1] %vm213_vm1, %v210_v5 }
  0x14 PF: > { %s12_s11 = sadd.s32 1, %s377_s11   ;;  %s424_s9 = smov %s373_s10 }
  0x15   : > { %p9_p5 = scmp.ge.s32.totalorder %s12_s11, 4   ;;  %s425_s10 = smov %s427_s12 }
  0x17   :  { %11 = sbr.rel (!%p9_p5) target bundleno = 2 (0x2), region = 61 }

</bundles_post_ra>
